<compile_context>
chip_gen: v6e
topology: v6e:2x2x1
jax: 0.10.0
libtpu: 0.0.40
codegen_flags: <defaults>
</compile_context>

<pallas_src>
import functools

import jax
import jax.numpy as jnp
from jax.experimental import pallas as pl
from jax.experimental.pallas import tpu as pltpu

LANE = 128   # TPU lane width
CBLK = 64    # channel sub-block size: keeps register accumulators ~16 vregs


# --------------------------------------------------------------------------
# Accumulation helpers (traced inside the kernel)
# --------------------------------------------------------------------------
def _accumulate_full_chunks(x_ref, sum_acc, max_acc, c0, cb, n_chunks, acc_w,
                            unroll):
    """Unmasked streaming add/max of n_chunks acc_w-wide chunks into scratch."""
    if n_chunks <= 0:
        return
    csl = slice(c0, c0 + cb)
    if n_chunks == 1:
        xj = x_ref[:, csl, 0:acc_w].astype(jnp.float32)
        sum_acc[:, csl, :] = sum_acc[:, csl, :] + xj
        max_acc[:, csl, :] = jnp.maximum(max_acc[:, csl, :], xj)
        return

    def body(j, carry):
        s, m = carry
        start = pl.multiple_of(j * acc_w, acc_w)
        xj = x_ref[:, csl, pl.ds(start, acc_w)].astype(jnp.float32)
        return s + xj, jnp.maximum(m, xj)

    s1, m1 = jax.lax.fori_loop(
        0, n_chunks, body,
        (sum_acc[:, csl, :], max_acc[:, csl, :]),
        unroll=min(unroll, n_chunks))
    sum_acc[:, csl, :] = s1
    max_acc[:, csl, :] = m1


def _accumulate_masked_chunk(x_ref, sum_acc, max_acc, c0, cb, chunk_idx, acc_w,
                             valid_w):
    """Single boundary chunk of the ragged last tile: lanes >= valid_w masked."""
    csl = slice(c0, c0 + cb)
    start = chunk_idx * acc_w                      # static
    xj = x_ref[:, csl, start:start + acc_w].astype(jnp.float32)
    lane = jax.lax.broadcasted_iota(jnp.int32, (1, 1, acc_w), 2)
    valid = lane < valid_w
    sum_acc[:, csl, :] = sum_acc[:, csl, :] + jnp.where(valid, xj, 0.0)
    max_acc[:, csl, :] = jnp.maximum(max_acc[:, csl, :],
                                     jnp.where(valid, xj, -jnp.inf))


# --------------------------------------------------------------------------
# Kernel
# --------------------------------------------------------------------------
def _channel_attention_kernel(
    x_ref,       # (1, C, tile_hw)  streamed input slab (current batch/HW tile)
    w1t_ref,     # (C, Cr)          first 1x1-conv weight, pre-transposed
    w2t_ref,     # (Cr, C)          second 1x1-conv weight, pre-transposed
    out_ref,     # (1, 1, C)        attention values for the current batch
    sum_acc,     # VMEM (1, C, acc_w) f32 running per-lane sum
    max_acc,     # VMEM (1, C, acc_w) f32 running per-lane max
    *,
    hw,          # true spatial size H*W
    acc_w,       # accumulator lane width (chunk width)
    n_sub,       # chunks per full tile
    c_blocks,    # tuple of (c0, cb) channel sub-blocks
    unroll,      # fori_loop unroll factor
    ragged,      # whether the last HW tile has padded lanes
    last_full,   # full chunks in the last tile (ragged only)
    last_valid,  # valid lanes in the boundary chunk of the last tile (ragged)
):
    k = pl.program_id(1)
    last = pl.num_programs(1) - 1

    # ---- init accumulators at the first HW tile of this batch row ----
    @pl.when(k == 0)
    def _():
        sum_acc[...] = jnp.zeros_like(sum_acc)
        max_acc[...] = jnp.full(max_acc.shape, -jnp.inf, dtype=max_acc.dtype)

    # ---- streaming accumulation (hot loop: unmasked VALU add/max only) ----
    if not ragged:
        for c0, cb in c_blocks:
            _accumulate_full_chunks(x_ref, sum_acc, max_acc, c0, cb,
                                    n_sub, acc_w, unroll)
    else:
        @pl.when(k != last)
        def _():
            for c0, cb in c_blocks:
                _accumulate_full_chunks(x_ref, sum_acc, max_acc, c0, cb,
                                        n_sub, acc_w, unroll)

        @pl.when(k == last)
        def _():
            for c0, cb in c_blocks:
                _accumulate_full_chunks(x_ref, sum_acc, max_acc, c0, cb,
                                        last_full, acc_w, unroll)
                if last_valid > 0:
                    _accumulate_masked_chunk(x_ref, sum_acc, max_acc, c0, cb,
                                             last_full, acc_w, last_valid)
                # fully padded chunks of the last tile are skipped entirely

    # ---- finalize: one small cross-lane reduce + shared MLP + sigmoid ----
    @pl.when(k == last)
    def _():
        avg = jnp.sum(sum_acc[...], axis=-1) * (1.0 / float(hw))   # (1, C)
        mx = jnp.max(max_acc[...], axis=-1)                        # (1, C)
        p = jnp.concatenate([avg, mx], axis=0)                     # (2, C)
        w1t = w1t_ref[...].astype(jnp.float32)
        w2t = w2t_ref[...].astype(jnp.float32)
        h = jnp.maximum(jnp.dot(p, w1t, preferred_element_type=jnp.float32), 0.0)
        o = jnp.dot(h, w2t, preferred_element_type=jnp.float32)    # (2, C)
        att = jax.nn.sigmoid(o[0:1] + o[1:2])                      # (1, C)
        out_ref[...] = att[None].astype(out_ref.dtype)             # (1, 1, C)


# --------------------------------------------------------------------------
# Wrapper
# --------------------------------------------------------------------------
def _generation_budget():
    """(tile_budget_bytes, vmem_limit_bytes or None) per TPU generation."""
    try:
        kind = jax.devices()[0].device_kind.lower()
    except Exception:
        kind = ""
    if "v5 lite" in kind or "v5e" in kind or "v5lite" in kind:
        return 4 << 20, None          # 2x4 MiB fits v5e's 16 MiB scoped default
    if "v6" in kind:
        return 8 << 20, None          # 2x8 MiB fits v6e's 32 MiB scoped default
    if "7" in kind:                   # TPU7x: 64 MiB physical VMEM, 3.2 TB/s HBM
        return 12 << 20, 40 << 20
    return 4 << 20, None              # unknown generation: safe default


def _pick_hw_tiling(hw, c, itemsize, tile_budget_bytes):
    """Returns (tile_hw, acc_w, n_sub)."""
    if hw <= LANE:
        return hw, hw, 1
    lanes_full = hw // LANE
    budget_lanes = max(1, tile_budget_bytes // (c * itemsize * LANE))
    n_sub = max(1, min(lanes_full, budget_lanes))
    return n_sub * LANE, LANE, n_sub


def channel_attention(x, w1, w2, *, tile_budget_bytes=None, unroll=8):
    """CBAM channel attention: sigmoid(MLP(avgpool(x)) + MLP(maxpool(x))).

    x:  (B, C, H, W)  float32 or bfloat16
    w1: (C//r, C)     Conv2d(C, C//r, 1, bias=False) weight (squeezed)
    w2: (C, C//r)     Conv2d(C//r, C, 1, bias=False) weight (squeezed)
    Returns (B, C, 1, 1) in x.dtype, matching the PyTorch module.
    """
    B, C, H, W = x.shape
    cr = w1.shape[0]
    assert w1.shape == (cr, C) and w2.shape == (C, cr), (w1.shape, w2.shape)
    hw = H * W

    x_flat = x.reshape(B, C, hw)
    w1t = jnp.transpose(w1)  # (C, Cr) — contraction-ready, no in-kernel transpose
    w2t = jnp.transpose(w2)  # (Cr, C)

    budget, vmem_limit = _generation_budget()
    if tile_budget_bytes is not None:
        budget = tile_budget_bytes

    itemsize = jnp.dtype(x.dtype).itemsize
    tile_hw, acc_w, n_sub = _pick_hw_tiling(hw, C, itemsize, budget)
    num_hw_tiles = pl.cdiv(hw, tile_hw)

    ragged = (hw % tile_hw) != 0
    if ragged:
        rem = hw - (num_hw_tiles - 1) * tile_hw
        last_full = rem // acc_w
        last_valid = rem % acc_w
    else:
        last_full, last_valid = n_sub, 0

    c_blocks = tuple((c0, min(CBLK, C - c0)) for c0 in range(0, C, CBLK))

    kernel = functools.partial(
        _channel_attention_kernel,
        hw=hw, acc_w=acc_w, n_sub=n_sub, c_blocks=c_blocks, unroll=unroll,
        ragged=ragged, last_full=last_full, last_valid=last_valid)

    cp_kwargs = dict(dimension_semantics=("parallel", "arbitrary"))
    if vmem_limit is not None:
        cp_kwargs["vmem_limit_bytes"] = int(vmem_limit)

    out = pl.pallas_call(
        kernel,
        out_shape=jax.ShapeDtypeStruct((B, 1, C), x.dtype),
        grid=(B, num_hw_tiles),
        in_specs=[
            # streamed input: one (1, C, tile_hw) slab per grid step
            pl.BlockSpec((1, C, tile_hw), lambda b, k: (b, 0, k)),
            # tiny weights: constant block index -> DMA'd once, VMEM-resident
            pl.BlockSpec((C, cr), lambda b, k: (0, 0)),
            pl.BlockSpec((cr, C), lambda b, k: (0, 0)),
        ],
        out_specs=pl.BlockSpec((1, 1, C), lambda b, k: (b, 0, 0)),
        scratch_shapes=[
            pltpu.VMEM((1, C, acc_w), jnp.float32),  # running per-lane sum
            pltpu.VMEM((1, C, acc_w), jnp.float32),  # running per-lane max
        ],
        compiler_params=pltpu.CompilerParams(**cp_kwargs),
    )(x_flat, w1t, w2t)

    return out.reshape(B, C, 1, 1)


# --------------------------------------------------------------------------
# Reference + test
# --------------------------------------------------------------------------
def _reference(x, w1, w2):
    x = x.astype(jnp.float32)
    avg = jnp.mean(x, axis=(2, 3))
    mx = jnp.max(x, axis=(2, 3))

    def mlp(p):
        h = jnp.maximum(jnp.dot(p, w1.T, precision=jax.lax.Precision.HIGHEST), 0.0)
        return jnp.dot(h, w2.T, precision=jax.lax.Precision.HIGHEST)

    out = jax.nn.sigmoid(mlp(avg) + mlp(mx))
    return out.reshape(x.shape[0], x.shape[1], 1, 1)


if __name__ == "__main__":
    B, C, ratio = 2, 32, 16
    Cr = C // ratio  # 2

    key = jax.random.PRNGKey(0)
    kw1, kw2, kx1, kx2, kx3, kx4, kx5 = jax.random.split(key, 7)

    # Conv2d weights (squeezed from (out, in, 1, 1) to (out, in))
    w1 = jax.random.normal(kw1, (Cr, C), dtype=jnp.float32) * 0.1
    w2 = jax.random.normal(kw2, (C, Cr), dtype=jnp.float32) * 0.1

    ca = jax.jit(channel_attention, static_argnames=("tile_budget_bytes", "unroll"))

    # 16x16: multiple-of-128 spatial; 12x12 / 9x9: ragged / small tails.
    for kk, (H, W) in zip((kx1, kx2, kx3), ((16, 16), (12, 12), (9, 9))):
        x = jax.random.normal(kk, (B, C, H, W), dtype=jnp.float32)
        out = jax.block_until_ready(ca(x, w1, w2))
        ref = _reference(x, w1, w2)
        assert out.shape == (B, C, 1, 1), out.shape
        assert bool(jnp.all(jnp.isfinite(out)))
        assert bool(jnp.all((out > 0.0) & (out < 1.0)))  # sigmoid range
        assert bool(jnp.allclose(out, ref, atol=2e-3, rtol=2e-3)), (
            float(jnp.max(jnp.abs(out - ref))))

    # Multi-tile streaming + ragged last tile (full chunk + masked boundary):
    # small tile budget forces tile_hw=512 over hw=1200 -> 3 grid steps.
    x = jax.random.normal(kx4, (B, C, 40, 30), dtype=jnp.float32)
    out = jax.block_until_ready(ca(x, w1, w2, tile_budget_bytes=64 * 1024))
    ref = _reference(x, w1, w2)
    assert bool(jnp.allclose(out, ref, atol=2e-3, rtol=2e-3)), (
        float(jnp.max(jnp.abs(out - ref))))

    # bf16 activations (f32 accumulation inside the kernel).
    xb = jax.random.normal(kx5, (B, C, 16, 16), dtype=jnp.bfloat16)
    outb = jax.block_until_ready(ca(xb, w1, w2))
    refb = _reference(xb, w1, w2)
    assert outb.dtype == jnp.bfloat16
    assert bool(jnp.allclose(outb.astype(jnp.float32), refb, atol=2e-2, rtol=2e-2))

    print("KERNEL_OK")
</pallas_src>

<mosaic_0001>
module attributes {stable_mosaic.version = 11 : i64} {
  func.func @_channel_attention_kernel(%arg0: i32, %arg1: i32, %arg2: memref<1x32x256xf32, #tpu.memory_space<vmem>>, %arg3: memref<32x2xf32, #tpu.memory_space<vmem>>, %arg4: memref<2x32xf32, #tpu.memory_space<vmem>>, %arg5: memref<1x1x32xf32, #tpu.memory_space<vmem>>, %arg6: memref<1x32x128xf32, #tpu.memory_space<vmem>>, %arg7: memref<1x32x128xf32, #tpu.memory_space<vmem>>) attributes {dimension_semantics = [#tpu.dimension_semantics<parallel>, #tpu.dimension_semantics<arbitrary>], iteration_bounds = array<i64: 2, 1>, scalar_prefetch = 0 : i64, scratch_operands = 2 : i64, tpu.core_type = #tpu.core_type<tc>, window_params = [{transform_indices = @transform_0, window_bounds = array<i64: 1, 32, 256>}, {pipeline_mode = #tpu.pipeline_mode<synchronous>, transform_indices = @transform_1, window_bounds = array<i64: 32, 2>}, {pipeline_mode = #tpu.pipeline_mode<synchronous>, transform_indices = @transform_2, window_bounds = array<i64: 2, 32>}, {transform_indices = @transform_3, window_bounds = array<i64: 1, 1, 32>}]} {
    %c0_i32 = arith.constant 0 : i32
    %0 = arith.cmpi eq, %arg1, %c0_i32 : i32
    %1 = arith.extui %0 : i1 to i32
    %c0_i32_0 = arith.constant 0 : i32
    %2 = arith.cmpi ne, %1, %c0_i32_0 : i32
    scf.if %2 {
      %cst = arith.constant 0.000000e+00 : f32
      %22 = vector.broadcast %cst : f32 to vector<1x32x128xf32>
      %c0_20 = arith.constant 0 : index
      %c0_21 = arith.constant 0 : index
      %c0_22 = arith.constant 0 : index
      %23 = vector.load %arg6[%c0_20, %c0_21, %c0_22] : memref<1x32x128xf32, #tpu.memory_space<vmem>>, vector<1x32x128xf32>
      tpu.vector_store %arg6[%c0_20, %c0_21, %c0_22], %22 {strides = array<i32>} : memref<1x32x128xf32, #tpu.memory_space<vmem>>, vector<1x32x128xf32>,
      %cst_23 = arith.constant 0xFF800000 : f32
      %24 = vector.broadcast %cst_23 : f32 to vector<1x32x128xf32>
      %c0_24 = arith.constant 0 : index
      %c0_25 = arith.constant 0 : index
      %c0_26 = arith.constant 0 : index
      %25 = vector.load %arg7[%c0_24, %c0_25, %c0_26] : memref<1x32x128xf32, #tpu.memory_space<vmem>>, vector<1x32x128xf32>
      tpu.vector_store %arg7[%c0_24, %c0_25, %c0_26], %24 {strides = array<i32>} : memref<1x32x128xf32, #tpu.memory_space<vmem>>, vector<1x32x128xf32>,
    } else {
    }
    %c0 = arith.constant 0 : index
    %c0_1 = arith.constant 0 : index
    %c0_2 = arith.constant 0 : index
    %3 = vector.load %arg6[%c0, %c0_1, %c0_2] : memref<1x32x128xf32, #tpu.memory_space<vmem>>, vector<1x32x128xf32>
    %c0_3 = arith.constant 0 : index
    %c0_4 = arith.constant 0 : index
    %c0_5 = arith.constant 0 : index
    %4 = vector.load %arg7[%c0_3, %c0_4, %c0_5] : memref<1x32x128xf32, #tpu.memory_space<vmem>>, vector<1x32x128xf32>
    %c0_i32_6 = arith.constant 0 : i32
    %c128_i32 = arith.constant 128 : i32
    %5 = arith.muli %c0_i32_6, %c128_i32 : i32
    %6 = tpu.assume_multiple %5, 128 : i32
    %c0_7 = arith.constant 0 : index
    %c0_8 = arith.constant 0 : index
    %7 = arith.index_cast %6 : i32 to index
    %8 = vector.load %arg2[%c0_7, %c0_8, %7] : memref<1x32x256xf32, #tpu.memory_space<vmem>>, vector<1x32x128xf32>
    %9 = arith.addf %3, %8 : vector<1x32x128xf32>
    %10 = arith.maximumf %4, %8 : vector<1x32x128xf32>
    %c1_i32 = arith.constant 1 : i32
    %c128_i32_9 = arith.constant 128 : i32
    %11 = arith.muli %c1_i32, %c128_i32_9 : i32
    %12 = tpu.assume_multiple %11, 128 : i32
    %c0_10 = arith.constant 0 : index
    %c0_11 = arith.constant 0 : index
    %13 = arith.index_cast %12 : i32 to index
    %14 = vector.load %arg2[%c0_10, %c0_11, %13] : memref<1x32x256xf32, #tpu.memory_space<vmem>>, vector<1x32x128xf32>
    %15 = arith.addf %9, %14 : vector<1x32x128xf32>
    %16 = arith.maximumf %10, %14 : vector<1x32x128xf32>
    %c2_i32 = arith.constant 2 : i32
    %c0_12 = arith.constant 0 : index
    %c0_13 = arith.constant 0 : index
    %c0_14 = arith.constant 0 : index
    %17 = vector.load %arg6[%c0_12, %c0_13, %c0_14] : memref<1x32x128xf32, #tpu.memory_space<vmem>>, vector<1x32x128xf32>
    tpu.vector_store %arg6[%c0_12, %c0_13, %c0_14], %15 {strides = array<i32>} : memref<1x32x128xf32, #tpu.memory_space<vmem>>, vector<1x32x128xf32>,
    %c0_15 = arith.constant 0 : index
    %c0_16 = arith.constant 0 : index
    %c0_17 = arith.constant 0 : index
    %18 = vector.load %arg7[%c0_15, %c0_16, %c0_17] : memref<1x32x128xf32, #tpu.memory_space<vmem>>, vector<1x32x128xf32>
    tpu.vector_store %arg7[%c0_15, %c0_16, %c0_17], %16 {strides = array<i32>} : memref<1x32x128xf32, #tpu.memory_space<vmem>>, vector<1x32x128xf32>,
    %c0_i32_18 = arith.constant 0 : i32
    %19 = arith.cmpi eq, %arg1, %c0_i32_18 : i32
    %20 = arith.extui %19 : i1 to i32
    %c0_i32_19 = arith.constant 0 : i32
    %21 = arith.cmpi ne, %20, %c0_i32_19 : i32
    scf.if %21 {
      %c0_20 = arith.constant 0 : index
      %c0_21 = arith.constant 0 : index
      %c0_22 = arith.constant 0 : index
      %22 = vector.load %arg6[%c0_20, %c0_21, %c0_22] : memref<1x32x128xf32, #tpu.memory_space<vmem>>, vector<1x32x128xf32>
      %cst = arith.constant dense<0.000000e+00> : vector<1x32xf32>
      %23 = vector.multi_reduction <add>, %22, %cst [2] : vector<1x32x128xf32> to vector<1x32xf32>
      %cst_23 = arith.constant 3.906250e-03 : f32
      %24 = vector.broadcast %cst_23 : f32 to vector<1x32xf32>
      %25 = arith.mulf %23, %24 : vector<1x32xf32>
      %c0_24 = arith.constant 0 : index
      %c0_25 = arith.constant 0 : index
      %c0_26 = arith.constant 0 : index
      %26 = vector.load %arg7[%c0_24, %c0_25, %c0_26] : memref<1x32x128xf32, #tpu.memory_space<vmem>>, vector<1x32x128xf32>
      %cst_27 = arith.constant dense<0xFF800000> : vector<1x32xf32>
      %27 = vector.multi_reduction <maximumf>, %26, %cst_27 [2] : vector<1x32x128xf32> to vector<1x32xf32>
      %28 = tpu.concatenate %25, %27 in 0 : vector<1x32xf32>, vector<1x32xf32> -> vector<2x32xf32>
      %c0_28 = arith.constant 0 : index
      %c0_29 = arith.constant 0 : index
      %29 = vector.load %arg3[%c0_28, %c0_29] : memref<32x2xf32, #tpu.memory_space<vmem>>, vector<32x2xf32>
      %c0_30 = arith.constant 0 : index
      %c0_31 = arith.constant 0 : index
      %30 = vector.load %arg4[%c0_30, %c0_31] : memref<2x32xf32, #tpu.memory_space<vmem>>, vector<2x32xf32>
      %cst_32 = arith.constant dense<0.000000e+00> : vector<2x2xf32>
      %31 = tpu.matmul %28, %29, %cst_32 {dimension_numbers = #tpu.dot_dimension_numbers<[1], [0], [0], [1], [0, 0, 1, 1], [], []>} : vector<2x32xf32>, vector<32x2xf32>, vector<2x2xf32> -> vector<2x2xf32>
      %cst_33 = arith.constant 0.000000e+00 : f32
      %32 = vector.broadcast %cst_33 : f32 to vector<2x2xf32>
      %33 = arith.maximumf %31, %32 : vector<2x2xf32>
      %cst_34 = arith.constant dense<0.000000e+00> : vector<2x32xf32>
      %34 = tpu.matmul %33, %30, %cst_34 {dimension_numbers = #tpu.dot_dimension_numbers<[1], [0], [0], [1], [0, 0, 1, 1], [], []>} : vector<2x2xf32>, vector<2x32xf32>, vector<2x32xf32> -> vector<2x32xf32>
      %35 = vector.extract_strided_slice %34 {offsets = [0, 0], sizes = [1, 32], strides = [1, 1]} : vector<2x32xf32> to vector<1x32xf32>
      %36 = vector.extract_strided_slice %34 {offsets = [1, 0], sizes = [1, 32], strides = [1, 1]} : vector<2x32xf32> to vector<1x32xf32>
      %37 = arith.addf %35, %36 : vector<1x32xf32>
      %38 = arith.negf %37 : vector<1x32xf32>
      %39 = math.exp %38 : vector<1x32xf32>
      %cst_35 = arith.constant 1.000000e+00 : f32
      %40 = vector.broadcast %cst_35 : f32 to vector<1x32xf32>
      %41 = arith.addf %40, %39 : vector<1x32xf32>
      %42 = arith.divf %40, %41 : vector<1x32xf32>
      %43 = vector.shape_cast %42 : vector<1x32xf32> to vector<1x1x32xf32>
      %c0_36 = arith.constant 0 : index
      %c0_37 = arith.constant 0 : index
      %c0_38 = arith.constant 0 : index
      %44 = vector.load %arg5[%c0_36, %c0_37, %c0_38] : memref<1x1x32xf32, #tpu.memory_space<vmem>>, vector<1x1x32xf32>
      tpu.vector_store %arg5[%c0_36, %c0_37, %c0_38], %43 {strides = array<i32>} : memref<1x1x32xf32, #tpu.memory_space<vmem>>, vector<1x1x32xf32>,
    } else {
    }
    return
  }
  func.func @transform_0(%arg0: i32, %arg1: i32) -> (i32, i32, i32) {
    %c0_i32 = arith.constant 0 : i32
    %c0_i32_0 = arith.constant 0 : i32
    return %arg0, %c0_i32, %arg1 : i32, i32, i32
  }
  func.func @transform_1(%arg0: i32, %arg1: i32) -> (i32, i32) {
    %c0_i32 = arith.constant 0 : i32
    %c0_i32_0 = arith.constant 0 : i32
    %c0_i32_1 = arith.constant 0 : i32
    return %c0_i32, %c0_i32_0 : i32, i32
  }
  func.func @transform_2(%arg0: i32, %arg1: i32) -> (i32, i32) {
    %c0_i32 = arith.constant 0 : i32
    %c0_i32_0 = arith.constant 0 : i32
    %c0_i32_1 = arith.constant 0 : i32
    return %c0_i32, %c0_i32_0 : i32, i32
  }
  func.func @transform_3(%arg0: i32, %arg1: i32) -> (i32, i32, i32) {
    %c0_i32 = arith.constant 0 : i32
    %c0_i32_0 = arith.constant 0 : i32
    %c0_i32_1 = arith.constant 0 : i32
    return %arg0, %c0_i32, %c0_i32_0 : i32, i32, i32
  }
}

</mosaic_0001>

<bundles_post_ra>
// kernel: channel_attention.1
= control target key start
LH: loop header
LB: loop body
LE: loop exit
PB: predicated region body
PF: predicated region fallthrough
CT: control target
= control target key end

     0   :  { %8 = vsyncpa [#allocation5], 0  ;;  %s916_s0 = inlined_call_operand.vmem [shape: f32[2,32,256], index: 0, kind: input, shape index: {}]   ;;  %s917_s1 = inlined_call_operand.vmem [shape: f32[32,2], index: 1, kind: input, shape index: {}]   ;;  %s918_s2 = inlined_call_operand.vmem [shape: f32[2,32], index: 2, kind: input, shape index: {}]   ;;  %s919_s3 = inlined_call_operand.hbm [shape: f32[2,1,32], index: 3, kind: output, shape index: {}]  }
   0x1   :  { %10 = vsyncpa [#allocation5 + $0x1], 0  ;;  %s794_s12 = smov 0   ;;  %s796_s13 = smov 0  }
   0x2   :  { %s798_s14 = smov 0   ;;  %s800_s15 = smov 0  }
   0x3   :  { %s802_s16 = smov 0   ;;  %s804_s17 = smov 0  }
   0x4 LB: > { %s590_s18 = sadd.s32 4294967295, %s769_s17   ;;  %s591_s19 = sadd.s32 4294967294, %s769_s17   ;;  %s769_s17 = sphi %s804_s17, %s16_s17   ;;  %s765_s16 = sphi %s802_s16, %s926_s16   ;;  %s761_s15 = sphi %s800_s15, %s925_s15   ;;  %s757_s14 = sphi %s798_s14, %s924_s14   ;;  %s753_s13 = sphi %s796_s13, %s923_s13   ;;  %s749_s12 = sphi %s794_s12, %s922_s12  }
   0x5   : > { %s28_s20 = sadd.s32 1, %s765_s16  ;;  %s105_s21 = sadd.s32 1, %s757_s14 }
   0x6   : > { %p30_p0 = scmp.ge.s32.totalorder %s28_s20, 2  ;;  %p115_p1 = scmp.ne.s32.totalorder %s757_s14, %s753_s13 }
   0x7   : > { %p116_p2 = scmp.eq.s32.totalorder %s590_s18, 1  ;;  %p121_p3 = scmp.ne.s32.totalorder %s753_s13, %s749_s12 }
   0x8   : > { %s928_s20 = smov (%p30_p0, %s28_s20), 0  ;;  %p122_p5 = scmp.eq.s32.totalorder %s591_s19, 1 }
   0x9   : > { %p834_p4 = por %p116_p2, %p115_p1  ;;  %s102_s23 = ssub.s32 %s765_s16, %s928_s20 }
   0xa   : > { %p594_p6 = scmp.ge.s32.totalorder %s769_s17, 1  ;;  %p103_p7 = scmp.eq.s32.totalorder %s102_s23, 0 }
   0xb   : > { %p841_p8 = por %p122_p5, %p121_p3  ;;  %p159_p9 = scmp.lt.s32.totalorder %s769_s17, 3 }
   0xc   : > { %s847_s25 = scalar_select %p103_p7, %s757_s14, %s105_s21  }
   0xd   : > { %p160_p10 = pnand %p594_p6, %p159_p9 }
   0xe   : > { %p187_p11 = scmp.lt.s32.totalorder (!%p160_p10), %s761_s15, 1  ;;  %s184_s21 = sand.u32 (!%p160_p10), 1, %s753_s13  }
   0xf   : > { %163 = sbr.rel (%p160_p10) target bundleno = 620 (0x26c), region = 32  ;;  %s605_s23 = sshll.u32 (!%p160_p10), %s761_s15, 4 }
  0x10   : > { %s509_s4 = scalar_lea.sflag (!%p160_p10), [#allocation5], %s184_s21  ;;  %s773_s6 = smov (!%p160_p10), [#allocation4]  }
  0x11   : > { %s697_s7 = sshll.u32 (!%p160_p10), %s773_s6, 4  ;;  %s698_s7 = int_to_ptr.vmem [resolvable:$false] %s697_s7 }
  0x14   : > { %s188_s26 = scalar_select %p187_p11, %s761_s15, 1  ;;  %v771_v16 = vmov 0.0   ;;  %v341_v17 = vld [vmem:[%s917_s1 + $0x18] sm:$0xff]  ;;  %v340_v18 = vld [vmem:[%s917_s1 + $0x10] sm:$0xff]  ;;  %v339_v19 = vld [vmem:[%s917_s1 + $0x8] sm:$0xff]  ;;  %vm772_vm0 = vmmov 0   ;;  %v284_v21 = vlaneseq }
  0x15   : > { %616 = vmatprep.subr.mxu0 %v771_v16  ;;  %627 = vmatprep.subr.mxu1 %v771_v16  ;;  %v338_v20 = vld [vmem:[%s917_s1] sm:$0xff]  ;;  %vm295_vm1 = vcmask 130112   ;;  %vm302_vm2 = vcmask 195712   ;;  %vm309_vm3 = vcmask 261312   ;;  %vm336_vm4 = vcmask 1040384   ;;  %s699_s15 = scalar_lea.vmem %s698_s7, 32 }
  0x16   : > { %s608_s27 = sshll.u32 %s188_s26, 6  ;;  %617 = vmatpush3.msra.mxu0 %v341_v17  ;;  %624 = vmatprep.mubr.msk.f32.mxu0 %vm772_vm0, %v771_v16  ;;  %v285_v22 = vand.u32 127, %v284_v21  ;;  %v287_v25 = vshrl.u32 %v284_v21, 7  ;;  %vm343_vm5 = vcmask 261120   ;;  %v342_v58 = vld [vmem:[%s918_s2] sm:$0x3] }
  0x17   : > { %s194_s30 = scalar_lea.vmem %s916_s0, %s608_s27  ;;  %618 = vmatprep.subr.mxu0 %v771_v16  ;;  %629 = vmatprep.mubr.msk.f32.mxu1 %vm772_vm0, %v771_v16  ;;  %vm422_vm6 = vcmask 1041408   ;;  %vm418_vm7 = vcmask 15360   ;;  %s185_s26 = scalar_lea.vmem [#allocation4], %s184_s21  ;;  %vm506_vm8 = vcmask 253952  }
  0x18   : > { %v218_v0 = vld [vmem:[%s194_s30 + $0x20] sm:$0xff]  ;;  %v599_v1 = vld [vmem:[%s194_s30 + $0x28] sm:$0xff]  ;;  %v219_v5 = vld [vmem:[%s194_s30 + $0x30] sm:$0xff]  ;;  %619 = vmatpush3.msra.mxu0 %v340_v18  ;;  %v290_v24 = vadd.s32 4294967288, %v285_v22  ;;  %v297_v27 = vadd.s32 4294967280, %v285_v22  ;;  %v288_v30 = vsub.s32 %v285_v22, %v287_v25  ;;  %v304_v32 = vadd.s32 4294967272, %v285_v22  ;;  %628 = vmatpush3.msk.msra.mxu1 %vm422_vm6, %v342_v58 }
  0x19   : > { %v216_v2 = vld [vmem:[%s194_s30] sm:$0xff]  ;;  %v235_v3 = vadd.f32 %v599_v1, %v218_v0  ;;  %v597_v4 = vld [vmem:[%s194_s30 + $0x8] sm:$0xff]  ;;  %v600_v6 = vld [vmem:[%s194_s30 + $0x38] sm:$0xff]  ;;  %v239_v15 = vmax.f32 %v218_v0, %v599_v1  ;;  %620 = vmatprep.subr.mxu0 %v771_v16  ;;  %s521_s27 = sshll.u32 %s185_s26, 4  ;;  %s522_s27 = int_to_ptr.vmem [resolvable:$true] %s521_s27 }
  0x1a   : > { %v233_v7 = vadd.f32 %v597_v4, %v216_v2  ;;  %v217_v8 = vld [vmem:[%s194_s30 + $0x10] sm:$0xff]  ;;  %v598_v9 = vld [vmem:[%s194_s30 + $0x18] sm:$0xff]  ;;  %v236_v10 = vadd.f32 %v600_v6, %v219_v5  ;;  %v237_v13 = vmax.f32 %v216_v2, %v597_v4  ;;  %v240_v14 = vmax.f32 %v219_v5, %v600_v6  ;;  %621 = vmatpush3.msra.mxu0 %v339_v19  ;;  %s876_s30 = scalar_lea.hbm %s919_s3, %s605_s23  ;;  %s693_s5 = scalar_lea.vmem %s522_s27, 16 }
  0x1b   : > { %260 = vadd.xlane.f32.xlu1 %v235_v3  ;;  %v234_v11 = vadd.f32 %v598_v9, %v217_v8  ;;  %v238_v12 = vmax.f32 %v217_v8, %v598_v9  ;;  %622 = vmatprep.subr.mxu0 %v771_v16  ;;  %v293_v29 = vsub.s32 %v290_v24, %v287_v25  ;;  %p694_p12 = scmp.ne.s32.totalorder %s522_s27, %s693_s5  ;;  %p700_p1 = scmp.lt.s32.totalorder %s522_s27, %s698_s7 }
  0x1c   : > { %256 = vadd.xlane.f32.xlu0 %v233_v7  ;;  %623 = vmatpush3.msra.mxu0 %v338_v20  ;;  %v300_v35 = vsub.s32 %v297_v27, %v287_v25  ;;  %v307_v40 = vsub.s32 %v304_v32, %v287_v25  ;;  %p701_p2 = scmp.lt.s32.totalorder %s699_s15, %s693_s5 }
  0x1d   : > { %p695_p13 = pnand %p694_p12, %p834_p4 }
  0x1e   : > { %p702_p3 = por %p701_p2, %p700_p1 }
  0x1f   : > { %262 = vadd.xlane.f32.xlu1 %v236_v10  ;;  %p696_p0 = pneg %p695_p13 }
  0x20   : > { %258 = vadd.xlane.f32.xlu0 %v234_v11 }
  0x21   : > { %p703_p5 = pnand %p702_p3, %p696_p0 }
  0x23   : > { %274 = vmax.xlane.f32.xlu1 %v238_v12 }
  0x24   : > { %272 = vmax.xlane.f32.xlu0 %v237_v13 }
  0x27   : > { %278 = vmax.xlane.f32.xlu1 %v240_v14 }
  0x28   : > { %276 = vmax.xlane.f32.xlu0 %v239_v15 }
  0xa4   : > { %v261_v23 = vpop.xlane.xlu1 %260 }
  0xa5   : > { %v257_v26 = vpop.xlane.xlu0 %256  ;;  %v266_v36 = vmul.f32 0.00390625, %v261_v23 }
  0xa6   : > { %v264_v31 = vmul.f32 0.00390625, %v257_v26 }
  0xa7   : > { %v301_v46 = vrot.slane %v266_v36, %v300_v35 }
  0xa8   : > { %v263_v28 = vpop.xlane.xlu1 %262  ;;  %v289_v39 = vrot.slane %v264_v31, %v288_v30 }
  0xa9   : > { %v259_v33 = vpop.xlane.xlu0 %258  ;;  %v267_v41 = vmul.f32 0.00390625, %v263_v28 }
  0xaa   : > { %v265_v34 = vmul.f32 0.00390625, %v259_v33 }
  0xab   : > { %v308_v48 = vrot.slane %v267_v41, %v307_v40 }
  0xac   : > { %v294_v37 = vrot.slane %v265_v34, %v293_v29  ;;  %v275_v38 = vpop.xlane.xlu1 %274 }
  0xad   : > { %v273_v42 = vpop.xlane.xlu0 %272  ;;  %v323_v44 = vrot.slane %v275_v38, %v293_v29 }
  0xae   : > { %v296_v43 = vsel %vm295_vm1, %v294_v37, %v289_v39  ;;  %v319_v45 = vrot.slane %v273_v42, %v288_v30 }
  0xaf   : > { %v303_v52 = vsel %vm302_vm2, %v301_v46, %v296_v43 }
  0xb0   : > { %v279_v47 = vpop.xlane.xlu1 %278  ;;  %v324_v53 = vsel %vm295_vm1, %v323_v44, %v319_v45  ;;  %v310_v56 = vsel %vm309_vm3, %v308_v48, %v303_v52 }
  0xb1   : > { %v277_v49 = vpop.xlane.xlu0 %276  ;;  %v333_v50 = vrot.slane %v279_v47, %v307_v40 }
  0xb2   : > { %v328_v51 = vrot.slane %v277_v49, %v300_v35 }
  0xb4   : > { %v329_v54 = vsel %vm302_vm2, %v328_v51, %v324_v53 }
  0xb5   : > { %v334_v55 = vsel %vm309_vm3, %v333_v50, %v329_v54 }
  0xb6   : > { %v337_v57 = vsel %vm336_vm4, %v310_v56, %v334_v55 }
  0xb7   : > { %625 = vmatmul.mubr.msk.f32.vlgmr.msra.gmra.mxu0 %vm343_vm5, %v337_v57 }
 0x177   : > { %v413_v59 = vpop.f32.mrf.mxu0 }
 0x178   : > { %v417_v60 = vmax.f32 %v413_v59, 0.0 }
 0x179   : > { %v626_v61 = vpop.f32.mrf.mxu0 }
 0x17a   : > { %630 = vmatmul.mubr.msk.f32.vlgmr.msra.gmra.mxu1 %vm418_vm7, %v417_v60 }
 0x23a   : > { %v492_v62 = vpop.f32.mrf.mxu1 }
 0x23b   : > { %v497_v63 = vrot.slane %v492_v62, 1 }
 0x23c   : > { %v631_v0 = vpop.f32.mrf.mxu1 }
 0x23d   : > { %v499_v1 = vadd.f32 %v497_v63, %v492_v62 }
 0x23f   : > { %v604_v2 = vmul.f32 -1.442695, %v499_v1 }
 0x241   : > { %689 = vpow2.f32 %v604_v2 }
 0x24e   : > { %v690_v3 = vpop.eup %689 }
 0x24f   : > { %v503_v4 = vadd.f32 1.0, %v690_v3 }
 0x251   : > { %691 = vrcp.f32 %v503_v4 }
 0x25e   : > { %v692_v5 = vpop.eup %691 }
 0x25f   : > { %507 = vst.msk [vmem:[%s185_s26] sm:$0x1] %vm506_vm8, %v692_v5 }
 0x260   : > { %706 = shalt.err (!%p703_p5)
}
 0x261   : > { %s707_s8 = scalar_lea.hbm %s876_s30, 16  ;;  %s711_s11 = scalar_lea.hbm %s919_s3, 32 }
 0x262   : > { %p708_p6 = scmp.ne.s32.totalorder %s876_s30, %s707_s8  ;;  %p712_p10 = scmp.lt.s32.totalorder %s876_s30, %s919_s3 }
 0x263   : > { %p713_p11 = scmp.lt.s32.totalorder %s711_s11, %s707_s8 }
 0x264   : > { %p709_p7 = pnand %p708_p6, %p834_p4 }
 0x265   : > { %p714_p12 = por %p713_p11, %p712_p10 }
 0x266   : > { %p710_p9 = pneg %p709_p7 }
 0x268   : > { %p715_p13 = pnand %p714_p12, %p710_p9 }
 0x26a   : > { %718 = shalt.err (!%p715_p13)
}
 0x26b   : > { %632 = dma.vmem_to_hbm [thread:$0]  (%p834_p4), %s522_s27, 16, %s876_s30, %s509_s4  }
 0x26c PF: > { %p638_p0 = scmp.ge.s32.totalorder %s769_s17, 2  ;;  %s533_s21 = sand.u32 1, %s749_s12  }
 0x26d   : > { %s534_s23 = scalar_lea.sflag [#allocation5], %s533_s21 }
 0x26e   : > { %p635_p1 = pnand %p638_p0, %p841_p8 }
 0x270   : > { %p636_p2 = pneg %p635_p1 }
 0x272   : > { %744 = dma.done.wait (%p636_p2), %s534_s23, 16  }
 0x273   : > { %746 = vsyncadd (%p636_p2), %s534_s23, 4294967280  ;;  %s16_s17 = sadd.s32 1, %s769_s17   ;;  %s922_s12 = smov %s753_s13 }
 0x274   : > { %p13_p3 = scmp.ge.s32.totalorder %s16_s17, 4   ;;  %s923_s13 = smov %s757_s14 }
 0x275   : > { %s924_s14 = smov %s847_s25  ;;  %s925_s15 = smov %s765_s16 }
 0x276   : > { %s926_s16 = smov %s928_s20  ;;  %15 = sbr.rel (!%p13_p3) target bundleno = 4 (0x4), region = 76 }
 0x27b   :  { %538 = vsyncpa [#allocation5], 1 }
 0x27c   :  { %540 = vsyncpa [#allocation5 + $0x1], 1 }

</bundles_post_ra>
